<compile_context>
chip_gen: v6e
topology: v6e:2x2x1
jax: 0.10.0
libtpu: 0.0.40
codegen_flags: <defaults>
</compile_context>

<pallas_src>
import math

import jax
import jax.numpy as jnp
from jax.experimental import pallas as pl
from jax.experimental.pallas import tpu as pltpu


EPS = 1e-6


def _round_up(x: int, m: int) -> int:
    return -(-x // m) * m


def _int_pow(x, n: int):
    """x**n for a static positive integer n (exponentiation by squaring, VPU only)."""
    acc = None
    base = x
    while n > 0:
        if n & 1:
            acc = base if acc is None else acc * base
        n >>= 1
        if n > 0:
            base = base * base
    return acc


def _pick_group(nc: int, hw: int) -> int:
    """Rows fused per super-row: smallest G with (G*HW) % 128 == 0 that divides NC."""
    g = 128 // math.gcd(hw, 128)
    return g if (g > 1 and nc % g == 0) else 1


def _make_selector(hw: int, g: int):
    """(G*HW, G) block-diagonal ones: column g sums lanes [g*HW, (g+1)*HW)."""
    rows = jnp.arange(g * hw, dtype=jnp.int32) // hw
    cols = jnp.arange(g, dtype=jnp.int32)
    return (rows[:, None] == cols[None, :]).astype(jnp.float32)


def _vmem_plan() -> tuple[int, int]:
    """(planning budget, scoped vmem_limit_bytes), generation-aware."""
    try:
        cap = int(pltpu.get_tpu_info().vmem_capacity_bytes)   # 128 MiB v5e/v6e, 64 MiB v7x
    except Exception:
        cap = 64 << 20
    budget = max(16 << 20, min(cap // 2, 64 << 20))
    limit = max(budget, min(cap * 3 // 4, 96 << 20))          # headroom over the plan
    return budget, limit


def _pick_tb(r: int, l: int, itemsize: int, budget: int, sel_bytes: int) -> int:
    """Super-rows per grid step, with lane-padded, dtype-aware VMEM accounting."""
    lanes = _round_up(l, 128)                    # lane-padded row length in VMEM
    row_in = lanes * itemsize                    # streamed (input-dtype) bytes / row
    row_f32 = lanes * 4                          # f32 compute-temporary bytes / row
    # 2 pipeline buffers of the streamed block + ~3 block-sized f32 temps,
    # plus the (double-buffered) selector and ~1 MiB slack for output/scratch.
    usable = max(budget - 2 * sel_bytes - (1 << 20), 1 << 20)
    per_row = 2 * row_in + 3 * row_f32
    tb = max(1, usable // per_row)
    sub = 8 * max(1, 4 // itemsize)              # sublane multiple: f32->8, bf16->16
    if r >= 4 * sub:
        # keep >= 4 grid steps: pipelining + both v7x TensorCores get work
        tb = min(tb, _round_up(pl.cdiv(r, 4), sub))
        tb = max(sub, (tb // sub) * sub)
    return min(tb, r)


def _gem_compute(x_ref, sel_ref, o_ref, p, hw, pow_fn):
    """Shared body.  sel_ref=None -> plain row sum; else MXU segmented reduce."""
    x = x_ref[...].astype(jnp.float32)
    xp = pow_fn(jnp.maximum(x, EPS))
    if sel_ref is None:
        s = jnp.sum(xp, axis=1, keepdims=True)                       # (tb, 1)
    else:
        # Segmented per-original-row sums on the otherwise idle MXU.  HIGHEST
        # precision keeps the f32 accumulation exact enough (no bf16 1-pass).
        s = jnp.dot(xp, sel_ref[...], preferred_element_type=jnp.float32,
                    precision=jax.lax.Precision.HIGHEST)             # (tb, G)
    # mean**(1/p) = exp((log(sum) - log(H*W)) / p); lane-dense when grouped.
    o_ref[...] = jnp.exp((jnp.log(s) - math.log(float(hw))) * (1.0 / p)).astype(o_ref.dtype)


def _make_const_p_kernel(p_const: float, hw: int, grouped: bool):
    p_round = int(round(p_const))
    if abs(p_const - p_round) < 1e-6 and 1 <= p_round <= 16:
        pow_fn = lambda xc: _int_pow(xc, p_round)                    # VPU multiplies only
    else:
        pow_fn = lambda xc: jnp.exp(jnp.float32(p_const) * jnp.log(xc))
    if grouped:
        def kernel(x_ref, sel_ref, o_ref):
            _gem_compute(x_ref, sel_ref, o_ref, p_const, hw, pow_fn)
    else:
        def kernel(x_ref, o_ref):
            _gem_compute(x_ref, None, o_ref, p_const, hw, pow_fn)
    return kernel


def _make_dyn_p_kernel(hw: int, grouped: bool):
    if grouped:
        def kernel(p_ref, x_ref, sel_ref, o_ref):
            p = p_ref[0]
            _gem_compute(x_ref, sel_ref, o_ref, p, hw, lambda xc: jnp.exp(p * jnp.log(xc)))
    else:
        def kernel(p_ref, x_ref, o_ref):
            p = p_ref[0]
            _gem_compute(x_ref, None, o_ref, p, hw, lambda xc: jnp.exp(p * jnp.log(xc)))
    return kernel


def gem_pallas(x, p_param):
    """x: (N, C, H, W), p_param: (1,) learnable exponent. Returns (N, C, 1, 1)."""
    N, C, H, W = x.shape
    NC, HW = N * C, H * W
    G = _pick_group(NC, HW)
    grouped = G > 1
    R, L = NC // G, G * HW

    x2 = x.reshape(R, L)

    itemsize = jnp.dtype(x.dtype).itemsize
    budget, vmem_limit = _vmem_plan()
    sel_bytes = L * G * 4 if grouped else 0
    tb = _pick_tb(R, L, itemsize, budget, sel_bytes)
    grid = (pl.cdiv(R, tb),)

    x_spec = pl.BlockSpec((tb, L), lambda i: (i, 0))
    out_spec = pl.BlockSpec((tb, G), lambda i: (i, 0))
    out_shape = jax.ShapeDtypeStruct((R, G), x.dtype)
    cparams = pltpu.CompilerParams(
        dimension_semantics=("parallel",),
        vmem_limit_bytes=vmem_limit,
    )

    in_specs = [x_spec]
    operands = [x2]
    if grouped:
        in_specs.append(pl.BlockSpec((L, G), lambda i: (0, 0)))      # resident selector
        operands.append(_make_selector(HW, G))

    # Resolve p at trace time when it is concrete (usual nn.Parameter forward).
    try:
        p_const = float(jnp.asarray(p_param).reshape(-1)[0])
    except Exception:                                                # traced under jit
        p_const = None

    if p_const is not None:
        out = pl.pallas_call(
            _make_const_p_kernel(p_const, HW, grouped),
            out_shape=out_shape,
            grid=grid,
            in_specs=in_specs,
            out_specs=out_spec,
            compiler_params=cparams,
        )(*operands)
    else:
        p_arr = jnp.asarray(p_param, jnp.float32).reshape(1)
        out = pl.pallas_call(
            _make_dyn_p_kernel(HW, grouped),
            out_shape=out_shape,
            grid=grid,
            in_specs=[pl.BlockSpec(memory_space=pltpu.MemorySpace.SMEM)] + in_specs,
            out_specs=out_spec,
            compiler_params=cparams,
        )(p_arr, *operands)

    # out[r, g] is the pooled value of original row r*G + g -> row-major reshape.
    return out.reshape(N, C, 1, 1)


if __name__ == "__main__":
    key = jax.random.PRNGKey(0)
    k1, k2 = jax.random.split(key)

    def ref(x, p):
        pv = jnp.asarray(p, jnp.float32).reshape(())
        return jnp.mean(jnp.maximum(x, EPS) ** pv, axis=(2, 3), keepdims=True) ** (1.0 / pv)

    # nn.Parameter(torch.ones(1) * 3) default.
    p3 = jnp.ones((1,), dtype=jnp.float32) * 3.0
    p25 = jnp.ones((1,), dtype=jnp.float32) * 2.5

    # Case 1: HW multiple of 128 (no grouping), constant integer p -> VPU-only body.
    x1 = jax.random.normal(k1, (2, 4, 16, 16), dtype=jnp.float32)
    y1 = jax.block_until_ready(gem_pallas(x1, p3))

    # Case 2: HW = 7*7 = 49 with N*C % 128 == 0 -> lane-dense super-rows + MXU
    # segmented reduce.
    x2 = jax.random.normal(k2, (2, 64, 7, 7), dtype=jnp.float32)
    y2 = jax.block_until_ready(gem_pallas(x2, p3))

    # Case 3 / 4: traced p (under jit) -> dynamic SMEM-scalar kernel, both layouts.
    y3 = jax.block_until_ready(jax.jit(gem_pallas)(x1, p25))
    y4 = jax.block_until_ready(jax.jit(gem_pallas)(x2, p25))

    assert y1.shape == (2, 4, 1, 1)
    assert y2.shape == (2, 64, 1, 1)
    assert y3.shape == (2, 4, 1, 1)
    assert y4.shape == (2, 64, 1, 1)
    assert jnp.allclose(y1, ref(x1, p3), rtol=1e-4, atol=1e-5)
    assert jnp.allclose(y2, ref(x2, p3), rtol=1e-4, atol=1e-5)
    assert jnp.allclose(y3, ref(x1, p25), rtol=1e-4, atol=1e-5)
    assert jnp.allclose(y4, ref(x2, p25), rtol=1e-4, atol=1e-5)

    print("KERNEL_OK")
</pallas_src>

<mosaic_0001>
module attributes {stable_mosaic.version = 11 : i64} {
  func.func @kernel(%arg0: i32, %arg1: memref<8x256xf32, #tpu.memory_space<vmem>>, %arg2: memref<8x1xf32, #tpu.memory_space<vmem>>) attributes {dimension_semantics = [#tpu.dimension_semantics<parallel>], iteration_bounds = array<i64: 1>, scalar_prefetch = 0 : i64, scratch_operands = 0 : i64, tpu.core_type = #tpu.core_type<tc>, window_params = [{transform_indices = @transform_0, window_bounds = array<i64: 8, 256>}, {transform_indices = @transform_1, window_bounds = array<i64: 8, 1>}]} {
    %c0 = arith.constant 0 : index
    %c0_0 = arith.constant 0 : index
    %0 = vector.load %arg1[%c0, %c0_0] : memref<8x256xf32, #tpu.memory_space<vmem>>, vector<8x256xf32>
    %cst = arith.constant 9.99999997E-7 : f32
    %1 = vector.broadcast %cst : f32 to vector<8x256xf32>
    %2 = arith.maximumf %0, %1 : vector<8x256xf32>
    %3 = arith.mulf %2, %2 : vector<8x256xf32>
    %4 = arith.mulf %2, %3 : vector<8x256xf32>
    %cst_1 = arith.constant dense<0.000000e+00> : vector<8xf32>
    %5 = vector.multi_reduction <add>, %4, %cst_1 [1] : vector<8x256xf32> to vector<8xf32>
    %6 = vector.shape_cast %5 : vector<8xf32> to vector<8x1xf32>
    %7 = math.log %6 : vector<8x1xf32>
    %cst_2 = arith.constant 5.54517746 : f32
    %8 = vector.broadcast %cst_2 : f32 to vector<8x1xf32>
    %9 = arith.subf %7, %8 : vector<8x1xf32>
    %cst_3 = arith.constant 0.333333343 : f32
    %10 = vector.broadcast %cst_3 : f32 to vector<8x1xf32>
    %11 = arith.mulf %9, %10 : vector<8x1xf32>
    %12 = math.exp %11 : vector<8x1xf32>
    %c0_4 = arith.constant 0 : index
    %c0_5 = arith.constant 0 : index
    %13 = vector.load %arg2[%c0_4, %c0_5] : memref<8x1xf32, #tpu.memory_space<vmem>>, vector<8x1xf32>
    tpu.vector_store %arg2[%c0_4, %c0_5], %12 {strides = array<i32>} : memref<8x1xf32, #tpu.memory_space<vmem>>, vector<8x1xf32>,
    return
  }
  func.func @transform_0(%arg0: i32) -> (i32, i32) {
    %c0_i32 = arith.constant 0 : i32
    %c0_i32_0 = arith.constant 0 : i32
    return %arg0, %c0_i32 : i32, i32
  }
  func.func @transform_1(%arg0: i32) -> (i32, i32) {
    %c0_i32 = arith.constant 0 : i32
    %c0_i32_0 = arith.constant 0 : i32
    return %arg0, %c0_i32 : i32, i32
  }
}

</mosaic_0001>

<bundles_post_ra>
// kernel: tpu_custom_call.1
= control target key start
LH: loop header
LB: loop body
LE: loop exit
PB: predicated region body
PF: predicated region fallthrough
CT: control target
= control target key end

     0   :  { %6 = vsyncpa [#allocation3], 0  ;;  %s72_s6 = smov [#allocation2]   ;;  %s89_s0 = inlined_call_operand.hbm [shape: f32[8,256], index: 0, kind: input, shape index: {}]   ;;  %s90_s1 = inlined_call_operand.vmem [shape: f32[8,1], index: 1, kind: output, shape index: {}]  }
   0x1   :  { %s13_s7 = sshll.u32 %s72_s6, 4  ;;  %s14_s7 = int_to_ptr.vmem [resolvable:$true] %s13_s7 }
   0x2   :  { %s58_s8 = scalar_lea.vmem %s14_s7, 256  ;;  %p63_p1 = scmp.lt.s32.totalorder %s14_s7, %s14_s7 }
   0x3   :  { %p59_p0 = scmp.ne.s32.totalorder %s14_s7, %s58_s8  ;;  %p64_p2 = scmp.lt.s32.totalorder %s58_s8, %s58_s8 }
   0x5   :  { %p65_p3 = por %p64_p2, %p63_p1 }
   0x7   :  { %p66_p4 = pnand %p65_p3, %p59_p0 }
   0x9   :  { %69 = shalt.err (!%p66_p4)
}
   0xa   :  { %16 = dma.hbm_to_vmem [thread:$0]  %s89_s0, 256, %s14_s7, [#allocation3]  }
   0xb   :  { %70 = dma.done.wait [#allocation3], 256  }
   0xc   :  { %71 = vsyncadd [#allocation3], 4294967040  ;;  %v20_v0 = vld [vmem:[#allocation2] sm:$0xff]  ;;  %v21_v1 = vld [vmem:[#allocation2 + $0x8] sm:$0xff]  ;;  %vm37_vm0 = vcmask 7168  }
   0xd   :  { %v22_v2 = vmax.f32 %v20_v0, 1e-06  ;;  %v23_v3 = vmax.f32 %v21_v1, 1e-06 }
   0xf   :  { %v24_v4 = vmul.f32 %v22_v2, %v22_v2  ;;  %v25_v5 = vmul.f32 %v23_v3, %v23_v3 }
  0x11   :  { %v26_v6 = vmul.f32 %v24_v4, %v22_v2  ;;  %v27_v7 = vmul.f32 %v25_v5, %v23_v3 }
  0x13   :  { %v28_v8 = vadd.f32 %v27_v7, %v26_v6 }
  0x15   :  { %29 = vadd.xlane.f32.xlu0 %v28_v8 }
  0x9e   :  { %v30_v9 = vpop.xlane.xlu0 %29 }
  0x9f   :  { %46 = vlog2.f32 %v30_v9 }
  0xac   :  { %v47_v10 = vpop.eup %46 }
  0xad   :  { %v32_v11 = vmul.f32 0.6931472, %v47_v10 }
  0xaf   :  { %v44_v12 = vadd.f32 -5.5451775, %v32_v11 }
  0xb1   :  { %v34_v13 = vmul.f32 0.33333334, %v44_v12 }
  0xb3   :  { %v35_v14 = vmul.f32 1.442695, %v34_v13 }
  0xb5   :  { %48 = vpow2.f32 %v35_v14 }
  0xc2   :  { %v49_v15 = vpop.eup %48 }
  0xc3   :  { %38 = vst.msk [vmem:[%s90_s1] sm:$0xff] %vm37_vm0, %v49_v15 }
  0xc4   :  { %43 = vsyncpa [#allocation3], 1 }

</bundles_post_ra>
